<compile_context>
chip_gen: v6e
topology: v6e:2x2x1
jax: 0.10.0
libtpu: 0.0.40
codegen_flags: <defaults>
</compile_context>

<pallas_src>
import functools

import jax
import jax.numpy as jnp
from jax import lax
from jax.experimental import pallas as pl
from jax.experimental.pallas import tpu as pltpu

WEIGHT_MUL = 0.000442  # constant from the PyTorch forward


def _round_up(x, m):
    return ((x + m - 1) // m) * m


def _matmul_nt(x_tile, w_tile):
    # x_tile: (tm, tk), w_tile: (tn, tk) -> (tm, tn), f32 accumulation on the MXU.
    # Contraction over the last dim of BOTH operands keeps the weight in its native
    # nn.Linear (out_dim, in_dim) layout -- no HBM transpose in the wrapper.
    if x_tile.dtype != w_tile.dtype:
        x_tile = x_tile.astype(w_tile.dtype)
    return lax.dot_general(
        x_tile,
        w_tile,
        dimension_numbers=(((1,), (1,)), ((), ())),
        preferred_element_type=jnp.float32,
    )


def _make_kernel(num_k, out_dtype):
    """Build the kernel body with the K-extent baked in statically.

    Returns (kernel_fn, needs_f32_scratch).
    """
    direct = out_dtype == jnp.float32

    if num_k == 1:
        # Single K step (the common case once tk is sized to the full in_dim):
        # one dot, scale fused into the only write, no branches, no scratch.
        def kernel(x_ref, w_ref, o_ref):
            o_ref[...] = (
                _matmul_nt(x_ref[...], w_ref[...]) * WEIGHT_MUL
            ).astype(o_ref.dtype)

        return kernel, False

    if direct:
        # f32 output: accumulate straight into the resident output block; the scale is
        # folded into the last accumulation step (no separate finalize read+write).
        def kernel(x_ref, w_ref, o_ref):
            k = pl.program_id(2)
            partial = _matmul_nt(x_ref[...], w_ref[...])

            @pl.when(k == 0)
            def _first():
                o_ref[...] = partial

            @pl.when(jnp.logical_and(k > 0, k < num_k - 1))
            def _mid():
                o_ref[...] += partial

            @pl.when(k == num_k - 1)
            def _last():
                o_ref[...] = (o_ref[...] + partial) * WEIGHT_MUL

        return kernel, False

    # Narrow output dtype: f32 VMEM accumulator, scale + cast fused into the last step.
    def kernel(x_ref, w_ref, o_ref, acc_ref):
        k = pl.program_id(2)
        partial = _matmul_nt(x_ref[...], w_ref[...])

        @pl.when(k == 0)
        def _first():
            acc_ref[...] = partial

        @pl.when(jnp.logical_and(k > 0, k < num_k - 1))
        def _mid():
            acc_ref[...] += partial

        @pl.when(k == num_k - 1)
        def _last():
            o_ref[...] = ((acc_ref[...] + partial) * WEIGHT_MUL).astype(o_ref.dtype)

    return kernel, True


def _vmem_budget_bytes():
    """Generation-aware VMEM budget: ~3/4 of physical, capped at 100 MiB."""
    physical = 0
    get_info = getattr(pltpu, "get_tpu_info", None)
    if get_info is not None:
        try:
            physical = int(getattr(get_info(), "vmem_capacity_bytes", 0) or 0)
        except Exception:
            physical = 0
    if physical <= 0:
        physical = 64 * 1024 * 1024  # conservative fallback: v7x-sized VMEM
    return min((physical * 3) // 4, 100 * 1024 * 1024)


def _largest_aligned_divisor(dim, cap, align):
    """Largest t <= cap with t % align == 0 and dim % t == 0 (dim itself if it fits).

    `dim` is always a multiple of `align` here (inputs are padded), so the loop always
    terminates with at least `align`.
    """
    if dim <= cap:
        return dim
    t = (cap // align) * align
    while t >= align:
        if dim % t == 0:
            return t
        t -= align
    return dim


def _choose_tiles(M, N, K, x_bytes, w_bytes, o_bytes, acc_bytes, budget):
    n_align = 256 if N % 256 == 0 else 128
    k_align = 256 if K % 256 == 0 else 128

    # Large weight blocks: fewer grid steps (~0.35 us each) and big, efficient weight DMAs.
    tk = _largest_aligned_divisor(K, 2048, k_align)
    tn = _largest_aligned_divisor(N, 1024, n_align)

    # Keep the double-buffered weight slab under ~2/3 of the budget so x/output fit too.
    while 2 * tn * tk * w_bytes > (2 * budget) // 3 and tn > n_align:
        tn = _largest_aligned_divisor(N, tn // 2, n_align)
    while 2 * tn * tk * w_bytes > (2 * budget) // 3 and tk > k_align:
        tk = _largest_aligned_divisor(K, tk // 2, k_align)

    # tm: take the whole (padded) batch whenever it fits the remaining budget, so the
    # weight is read from HBM exactly once; otherwise the largest 8-multiple that fits.
    per_tm = 2 * tk * x_bytes + tn * o_bytes + tn * acc_bytes
    rem = budget - 2 * tn * tk * w_bytes
    tm_cap = max(8, (rem // per_tm) // 8 * 8)
    tm = M if M <= tm_cap else _largest_aligned_divisor(M, tm_cap, 8)

    # v7x has 2 TensorCores: guarantee >= 2 independent "parallel" grid steps so both get
    # work (each streams a disjoint half of the weight). Near-zero cost on v5e/v6e.
    if (M // tm) * (N // tn) == 1 and N >= 256 and (N // 2) % 128 == 0:
        tn = N // 2

    return tm, tn, tk


@functools.partial(jax.jit, static_argnames=("stream_weights_bf16",))
def equal_linear_inverse(x, weight, *, stream_weights_bf16=False):
    """out = x @ (weight * 0.000442).T   (F.linear with no bias).

    x      : (batch, in_dim)
    weight : (out_dim, in_dim)   PyTorch nn.Linear layout -- NOT transposed here.
    stream_weights_bf16 : optional HBM-traffic optimization (numerics deviate slightly
                          from the f32 reference), default off.
    """
    batch, in_dim = x.shape
    out_dim, in_dim_w = weight.shape
    if in_dim != in_dim_w:
        raise ValueError("in_dim mismatch between x and weight")

    out_dtype = x.dtype

    if stream_weights_bf16:
        # Halves the dominant HBM traffic (weight bytes) at small batch; f32 accumulation
        # is kept inside the kernel via preferred_element_type.
        weight = weight.astype(jnp.bfloat16)

    # Pad to TPU-friendly multiples (8 sublanes x 128 lanes). Zero padding does not change
    # the valid region of x @ W.T; padded rows/cols are sliced off below. No-op for
    # already-aligned shapes.
    M = _round_up(batch, 8)
    K = _round_up(in_dim, 128)
    N = _round_up(out_dim, 128)
    xp = x if (M == batch and K == in_dim) else jnp.pad(
        x, ((0, M - batch), (0, K - in_dim)))
    wp = weight if (N == out_dim and K == in_dim) else jnp.pad(
        weight, ((0, N - out_dim), (0, K - in_dim)))

    budget = _vmem_budget_bytes()
    acc_bytes = 0 if out_dtype == jnp.float32 else 4
    tm, tn, tk = _choose_tiles(
        M, N, K,
        xp.dtype.itemsize, wp.dtype.itemsize, jnp.dtype(out_dtype).itemsize,
        acc_bytes, budget)

    grid = (M // tm, N // tn, K // tk)
    num_k = grid[2]

    kernel, needs_acc = _make_kernel(num_k, out_dtype)
    scratch = [pltpu.VMEM((tm, tn), jnp.float32)] if needs_acc else []

    # TODO(synk): sweep pipeline_mode=pl.Buffered(3) on the weight BlockSpec for v5e
    # (lowest HBM BW); keep default double-buffering until measured.
    out_padded = pl.pallas_call(
        kernel,
        out_shape=jax.ShapeDtypeStruct((M, N), out_dtype),
        grid_spec=pltpu.PrefetchScalarGridSpec(
            num_scalar_prefetch=0,
            grid=grid,
            in_specs=[
                pl.BlockSpec((tm, tk), lambda i, j, k: (i, k)),   # x tile
                pl.BlockSpec((tn, tk), lambda i, j, k: (j, k)),   # weight tile, native layout
            ],
            out_specs=pl.BlockSpec((tm, tn), lambda i, j, k: (i, j)),
            scratch_shapes=scratch,
        ),
        compiler_params=pltpu.CompilerParams(
            dimension_semantics=("parallel", "parallel", "arbitrary"),
            vmem_limit_bytes=budget,
        ),
    )(xp, wp)

    if M != batch or N != out_dim:
        out_padded = out_padded[:batch, :out_dim]
    return out_padded


if __name__ == "__main__":
    # Module hyper-params (synthetic, deterministic init -- no checkpoint load).
    batch, in_dim, out_dim = 8, 128, 256
    lr_mul = 0.01

    key = jax.random.PRNGKey(0)
    kx, kw = jax.random.split(key)

    # __init__: weight = randn(out_dim, in_dim) / lr_mul ; bias = zeros(out_dim)
    weight = jax.random.normal(kw, (out_dim, in_dim), dtype=jnp.float32) / lr_mul
    bias = jnp.zeros((out_dim,), dtype=jnp.float32)  # unused by the returned output
    # NOTE: fused_leaky_relu(input, bias**0.000442) in the PyTorch forward is dead code
    # (its result is immediately overwritten), so it does not affect the output.

    x = jax.random.normal(kx, (batch, in_dim), dtype=jnp.float32)

    out = jax.block_until_ready(equal_linear_inverse(x, weight))

    # correctness check against plain-JAX reference
    ref = x @ (weight * WEIGHT_MUL).T
    assert out.shape == (batch, out_dim)
    assert jnp.allclose(out, ref, atol=1e-4, rtol=1e-4), "mismatch vs reference"

    print("KERNEL_OK")
</pallas_src>

<mosaic_0001>
module attributes {stable_mosaic.version = 11 : i64} {
  func.func @kernel(%arg0: i32, %arg1: i32, %arg2: i32, %arg3: memref<8x128xf32, #tpu.memory_space<vmem>>, %arg4: memref<128x128xf32, #tpu.memory_space<vmem>>, %arg5: memref<8x128xf32, #tpu.memory_space<vmem>>) attributes {dimension_semantics = [#tpu.dimension_semantics<parallel>, #tpu.dimension_semantics<parallel>, #tpu.dimension_semantics<arbitrary>], iteration_bounds = array<i64: 1, 2, 1>, scalar_prefetch = 0 : i64, scratch_operands = 0 : i64, tpu.core_type = #tpu.core_type<tc>, window_params = [{transform_indices = @transform_0, window_bounds = array<i64: 8, 128>}, {transform_indices = @transform_1, window_bounds = array<i64: 128, 128>}, {transform_indices = @transform_2, window_bounds = array<i64: 8, 128>}]} {
    %c0 = arith.constant 0 : index
    %c0_0 = arith.constant 0 : index
    %0 = vector.load %arg3[%c0, %c0_0] : memref<8x128xf32, #tpu.memory_space<vmem>>, vector<8x128xf32>
    %c0_1 = arith.constant 0 : index
    %c0_2 = arith.constant 0 : index
    %1 = vector.load %arg4[%c0_1, %c0_2] : memref<128x128xf32, #tpu.memory_space<vmem>>, vector<128x128xf32>
    %cst = arith.constant dense<0.000000e+00> : vector<8x128xf32>
    %2 = tpu.matmul %0, %1, %cst {dimension_numbers = #tpu.dot_dimension_numbers<[1], [1], [0], [0], [0, 0, 1, 0], [], []>} : vector<8x128xf32>, vector<128x128xf32>, vector<8x128xf32> -> vector<8x128xf32>
    %cst_3 = arith.constant 4.420000e-04 : f32
    %3 = vector.broadcast %cst_3 : f32 to vector<8x128xf32>
    %4 = arith.mulf %2, %3 : vector<8x128xf32>
    %c0_4 = arith.constant 0 : index
    %c0_5 = arith.constant 0 : index
    %5 = vector.load %arg5[%c0_4, %c0_5] : memref<8x128xf32, #tpu.memory_space<vmem>>, vector<8x128xf32>
    tpu.vector_store %arg5[%c0_4, %c0_5], %4 {strides = array<i32>} : memref<8x128xf32, #tpu.memory_space<vmem>>, vector<8x128xf32>,
    return
  }
  func.func @transform_0(%arg0: i32, %arg1: i32, %arg2: i32) -> (i32, i32) {
    %c0_i32 = arith.constant 0 : i32
    return %arg0, %arg2 : i32, i32
  }
  func.func @transform_1(%arg0: i32, %arg1: i32, %arg2: i32) -> (i32, i32) {
    %c0_i32 = arith.constant 0 : i32
    return %arg1, %arg2 : i32, i32
  }
  func.func @transform_2(%arg0: i32, %arg1: i32, %arg2: i32) -> (i32, i32) {
    %c0_i32 = arith.constant 0 : i32
    return %arg0, %arg1 : i32, i32
  }
}

</mosaic_0001>

<bundles_post_ra>
// kernel: equal_linear_inverse.1
= control target key start
LH: loop header
LB: loop body
LE: loop exit
PB: predicated region body
PF: predicated region fallthrough
CT: control target
= control target key end

     0   :  { %7 = vsyncpa [#allocation3], 0  ;;  %s911_s0 = inlined_call_operand.hbm [shape: f32[8,128], index: 0, kind: input, shape index: {}]   ;;  %s912_s1 = inlined_call_operand.hbm [shape: f32[256,128], index: 1, kind: input, shape index: {}]   ;;  %s913_s2 = inlined_call_operand.hbm [shape: f32[8,256], index: 2, kind: output, shape index: {}]  }
   0x1   :  { %8 = vsyncpa [#allocation6], 0 }
   0x2   :  { %10 = vsyncpa [#allocation6 + $0x1], 0 }
   0x3   :  { %11 = vsyncpa [#allocation4], 0 }
   0x4   :  { %13 = vsyncpa [#allocation4 + $0x1], 0  ;;  %s723_s9 = smov 0   ;;  %s725_s10 = smov 0  }
   0x5   :  { %s727_s11 = smov 0   ;;  %s729_s12 = smov 0  }
   0x6   :  { %s731_s13 = smov 0   ;;  %s733_s14 = smov 0  }
   0x7 LB: > { %s415_s15 = sadd.s32 4294967295, %s699_s14   ;;  %s416_s16 = sadd.s32 4294967294, %s699_s14   ;;  %s699_s14 = sphi %s733_s14, %s19_s14   ;;  %s695_s13 = sphi %s731_s13, %s932_s13   ;;  %s691_s12 = sphi %s729_s12, %s931_s12   ;;  %s687_s11 = sphi %s727_s11, %s930_s11   ;;  %s683_s10 = sphi %s725_s10, %s929_s10   ;;  %s679_s9 = sphi %s723_s9, %s928_s9  }
   0x8   : > { %s75_s17 = sadd.s32 1, %s687_s11  ;;  %p82_p0 = scmp.ne.s32.totalorder %s687_s11, %s683_s10 }
   0x9   : > { %p83_p1 = scmp.eq.s32.totalorder %s699_s14, 0  ;;  %p88_p2 = scmp.ne.s32.totalorder %s683_s10, %s679_s9 }
   0xa   : > { %p761_p3 = scmp.eq.s32.totalorder %s415_s15, 0  ;;  %p114_p4 = scmp.eq.s32.totalorder %s415_s15, 1 }
   0xb   : > { %p765_p5 = por %p83_p1, %p82_p0  ;;  %p120_p6 = scmp.eq.s32.totalorder %s416_s16, 1 }
   0xc   : > { %p771_p7 = por %p761_p3, %p88_p2  ;;  %p775_p8 = por %p114_p4, %p82_p0 }
   0xd   : > { %p779_p9 = por %p120_p6, %p88_p2  ;;  %p417_p10 = scmp.ge.s32.totalorder %s699_s14, 1 }
   0xe   : > { %s918_s20 = scalar_select %p771_p7, 1, 0 }
   0xf   : > { %s919_s21 = scalar_select %p775_p8, 1, 0 }
  0x10   : > { %s920_s22 = scalar_select %p779_p9, 1, 0 }
  0x11   : > { %p127_p11 = scmp.lt.s32.totalorder %s699_s14, 3  ;;  %s701_s24 = smov [#allocation2]  }
  0x12   : > { %s143_s25 = sshll.u32 %s701_s24, 4  ;;  %p505_p1 = scmp.lt.s32.totalorder %s699_s14, 2  ;;  %s144_s25 = int_to_ptr.vmem [resolvable:$true] %s143_s25 }
  0x13   : > { %p786_p13 = pnand %p417_p10, %p127_p11  ;;  %s34_s28 = sadd.s32 1, %s695_s13 }
  0x14   : > { %p795_p4 = pnand %p505_p1, %p765_p5  ;;  %p36_p6 = scmp.ge.s32.totalorder %s34_s28, 2 }
  0x15   : > { %p492_p0 = pneg %p786_p13  ;;  %s154_s29 = sand.u32 1, %s687_s11  }
  0x16   : > { %s572_s30 = scalar_lea.vmem %s144_s25, 128  ;;  %p580_p8 = scmp.lt.s32.totalorder %s144_s25, %s144_s25 }
  0x17   : > { %p801_p2 = pnand %p492_p0, %p761_p3  ;;  %p573_p11 = scmp.ne.s32.totalorder %s144_s25, %s572_s30 }
  0x18   : > { %p581_p5 = scmp.lt.s32.totalorder %s572_s30, %s572_s30 }
  0x19   : > { %p563_p10 = pneg %p801_p2 }
  0x1a   : > { %p582_p1 = por %p581_p5, %p580_p8 }
  0x1b   : > { %p575_p12 = pnand %p573_p11, %p563_p10 }
  0x1d   : > { %p576_p9 = pneg %p575_p12 }
  0x1f   : > { %p583_p7 = pnand %p582_p1, %p576_p9 }
  0x21   : > { %586 = shalt.err (!%p583_p7)
}
  0x22   : > { %495 = dma.hbm_to_vmem [thread:$0]  (!%p801_p2), %s911_s0, 128, %s144_s25, [#allocation3]  }
  0x23   : > { %s934_s28 = smov (%p36_p6, %s34_s28), 0  ;;  %s420_s5 = sshll.u32 %s154_s29, 7 }
  0x24   : > { %s70_s6 = ssub.s32 %s695_s13, %s934_s28  ;;  %s431_s7 = sshll.u32 %s695_s13, 11 }
  0x25   : > { %p73_p12 = scmp.eq.s32.totalorder %s70_s6, 0  ;;  %s165_s16 = scalar_lea.hbm %s912_s1, %s431_s7 }
  0x26   : > { %s158_s19 = scalar_lea.vmem [#allocation5], %s420_s5  ;;  %s155_s30 = scalar_lea.sflag [#allocation6], %s154_s29 }
  0x27   : > { %s166_s24 = sshll.u32 %s158_s19, 4  ;;  %p589_p7 = pneg %p795_p4  ;;  %s167_s24 = int_to_ptr.vmem [resolvable:$true] %s166_s24 }
  0x28   : > { %s825_s27 = scalar_select %p73_p12, %s687_s11, %s75_s17  }
  0x29   : > { %s600_s25 = scalar_lea.vmem %s167_s24, 2048  ;;  %s702_s3 = smov [#allocation5]  }
  0x2a   : > { %p601_p8 = scmp.ne.s32.totalorder %s167_s24, %s600_s25  ;;  %s605_s4 = sshll.u32 %s702_s3, 4  ;;  %s606_s4 = int_to_ptr.vmem [resolvable:$false] %s605_s4 }
  0x2b   : > { %s607_s6 = scalar_lea.vmem %s606_s4, 4096  ;;  %p608_p2 = scmp.lt.s32.totalorder %s167_s24, %s606_s4 }
  0x2c   : > { %p603_p9 = pnand %p601_p8, %p589_p7  ;;  %p609_p6 = scmp.lt.s32.totalorder %s607_s6, %s600_s25 }
  0x2e   : > { %p604_p0 = pneg %p603_p9  ;;  %p610_p10 = por %p609_p6, %p608_p2 }
  0x30   : > { %p611_p11 = pnand %p610_p10, %p604_p0 }
  0x32   : > { %614 = shalt.err (!%p611_p11)
}
  0x33   : > { %s703_s5 = smov 128   ;;  %s704_s17 = smov 8  }
  0x34   : > { %499 = dma.hbm_to_vmem [thread:$0]  (!%p795_p4), %s165_s16, 2048, %s167_s24, %s155_s30, %s703_s5, %s703_s5, %s704_s17  }
  0x35   : > { %178 = sbr.rel (%p786_p13) target bundleno = 336 (0x150), region = 28 }
  0x3a   : > { %666 = dma.done.wait (%p761_p3), [#allocation3], 128  }
  0x3b   : > { %668 = vsyncadd (%p761_p3), [#allocation3], 4294967168  ;;  %s838_s29 = sand.u32 1, %s683_s10   ;;  %p924_p4 = scmp.ne.s32.totalorder %s918_s20, 0 }
  0x3c   : > { %s425_s7 = sshll.u32 %s838_s29, 7  ;;  %s185_s8 = scalar_lea.sflag [#allocation6], %s838_s29 }
  0x3d   : > { %s842_s15 = scalar_lea.vmem [#allocation5], %s425_s7 }
  0x3e   : > { %670 = dma.done.wait (%p924_p4), %s185_s8, 2048  }
  0x3f   : > { %672 = vsyncadd (%p924_p4), %s185_s8, 4294965248  ;;  %v705_v0 = vmov 0.0   ;;  %vm706_vm0 = vmmov 0   ;;  %v226_v1 = vld [vmem:[%s842_s15 + $0x78] sm:$0xff]  ;;  %v225_v2 = vld [vmem:[%s842_s15 + $0x70] sm:$0xff]  ;;  %s426_s18 = sshll.u32 %s838_s29, 3 }
  0x40   : > { %449 = vmatprep.subr.mxu0 %v705_v0  ;;  %481 = vmatprep.mubr.msk.f32.mxu0 %vm706_vm0, %v705_v0  ;;  %v224_v3 = vld [vmem:[%s842_s15 + $0x68] sm:$0xff]  ;;  %v223_v4 = vld [vmem:[%s842_s15 + $0x60] sm:$0xff]  ;;  %v222_v5 = vld [vmem:[%s842_s15 + $0x58] sm:$0xff]  ;;  %s428_s20 = sshll.u32 %s691_s12, 7  ;;  %s208_s23 = scalar_lea.vmem [#allocation7], %s426_s18 }
  0x41   : > { %450 = vmatpush3.xpose.msra.mxu0 %v226_v1  ;;  %v221_v6 = vld [vmem:[%s842_s15 + $0x50] sm:$0xff]  ;;  %v220_v7 = vld [vmem:[%s842_s15 + $0x48] sm:$0xff]  ;;  %v219_v8 = vld [vmem:[%s842_s15 + $0x40] sm:$0xff]  ;;  %s315_s26 = sshll.u32 %s208_s23, 4  ;;  %s869_s24 = scalar_lea.hbm %s913_s2, %s428_s20  ;;  %s316_s26 = int_to_ptr.vmem [resolvable:$true] %s315_s26 }
  0x42   : > { %451 = vmatprep.subr.mxu0 %v705_v0  ;;  %v218_v9 = vld [vmem:[%s842_s15 + $0x38] sm:$0xff]  ;;  %v217_v10 = vld [vmem:[%s842_s15 + $0x30] sm:$0xff]  ;;  %v216_v11 = vld [vmem:[%s842_s15 + $0x28] sm:$0xff]  ;;  %s300_s30 = scalar_lea.sflag [#allocation4], %s838_s29  ;;  %s615_s25 = scalar_lea.vmem %s316_s26, 128 }
  0x43   : > { %v215_v12 = vld [vmem:[%s842_s15 + $0x20] sm:$0xff]  ;;  %v214_v13 = vld [vmem:[%s842_s15 + $0x18] sm:$0xff]  ;;  %v213_v14 = vld [vmem:[%s842_s15 + $0x10] sm:$0xff]  ;;  %p616_p3 = scmp.ne.s32.totalorder %s316_s26, %s615_s25  ;;  %p925_p13 = scmp.ne.s32.totalorder %s919_s21, 0 }
  0x44   : > { %v212_v15 = vld [vmem:[%s842_s15 + $0x8] sm:$0xff]  ;;  %v211_v16 = vld [vmem:[%s842_s15] sm:$0xff]  ;;  %v210_v17 = vld [vmem:[#allocation2] sm:$0xff]  ;;  %s707_s3 = smov [#allocation7]  }
  0x45   : > { %452 = vmatpush3.xpose.msra.mxu0 %v225_v2  ;;  %p617_p5 = pnand %p616_p3, %p925_p13  ;;  %s619_s12 = sshll.u32 %s707_s3, 4  ;;  %s620_s12 = int_to_ptr.vmem [resolvable:$false] %s619_s12 }
  0x46   : > { %453 = vmatprep.subr.mxu0 %v705_v0  ;;  %s621_s4 = scalar_lea.vmem %s620_s12, 256  ;;  %p622_p12 = scmp.lt.s32.totalorder %s316_s26, %s620_s12 }
  0x47   : > { %p618_p1 = pneg %p617_p5  ;;  %p623_p7 = scmp.lt.s32.totalorder %s621_s4, %s615_s25 }
  0x49   : > { %454 = vmatpush3.xpose.msra.mxu0 %v224_v3  ;;  %p624_p8 = por %p623_p7, %p622_p12 }
  0x4a   : > { %455 = vmatprep.subr.mxu0 %v705_v0 }
  0x4b   : > { %p625_p9 = pnand %p624_p8, %p618_p1 }
  0x4d   : > { %456 = vmatpush3.xpose.msra.mxu0 %v223_v4 }
  0x4e   : > { %457 = vmatprep.subr.mxu0 %v705_v0 }
  0x51   : > { %458 = vmatpush3.xpose.msra.mxu0 %v222_v5 }
  0x52   : > { %459 = vmatprep.subr.mxu0 %v705_v0 }
  0x55   : > { %460 = vmatpush3.xpose.msra.mxu0 %v221_v6 }
  0x56   : > { %461 = vmatprep.subr.mxu0 %v705_v0 }
  0x59   : > { %462 = vmatpush3.xpose.msra.mxu0 %v220_v7 }
  0x5a   : > { %463 = vmatprep.subr.mxu0 %v705_v0 }
  0x5d   : > { %464 = vmatpush3.xpose.msra.mxu0 %v219_v8 }
  0x5e   : > { %465 = vmatprep.subr.mxu0 %v705_v0 }
  0x61   : > { %466 = vmatpush3.xpose.msra.mxu0 %v218_v9 }
  0x62   : > { %467 = vmatprep.subr.mxu0 %v705_v0 }
  0x65   : > { %468 = vmatpush3.xpose.msra.mxu0 %v217_v10 }
  0x66   : > { %469 = vmatprep.subr.mxu0 %v705_v0 }
  0x69   : > { %470 = vmatpush3.xpose.msra.mxu0 %v216_v11 }
  0x6a   : > { %471 = vmatprep.subr.mxu0 %v705_v0 }
  0x6d   : > { %472 = vmatpush3.xpose.msra.mxu0 %v215_v12 }
  0x6e   : > { %473 = vmatprep.subr.mxu0 %v705_v0 }
  0x71   : > { %474 = vmatpush3.xpose.msra.mxu0 %v214_v13 }
  0x72   : > { %475 = vmatprep.subr.mxu0 %v705_v0 }
  0x75   : > { %476 = vmatpush3.xpose.msra.mxu0 %v213_v14 }
  0x76   : > { %477 = vmatprep.subr.mxu0 %v705_v0 }
  0x79   : > { %478 = vmatpush3.xpose.msra.mxu0 %v212_v15 }
  0x7a   : > { %479 = vmatprep.subr.mxu0 %v705_v0 }
  0x7d   : > { %480 = vmatpush3.xpose.msra.mxu0 %v211_v16 }
  0x80   : > { %482 = vmatmul.mubr.f32.vlgmr.msra.gmra.mxu0 %v210_v17 }
 0x140   : > { %v293_v18 = vpop.f32.mrf.mxu0 }
 0x141   : > { %v297_v19 = vmul.f32 0.000442, %v293_v18 }
 0x142   : > { %v483_v20 = vpop.f32.mrf.mxu0 }
 0x143   : > { %298 = vst [vmem:[%s208_s23] sm:$0xff] %v297_v19 }
 0x144   : > { %628 = shalt.err (!%p625_p9)
}
 0x145   : > { %s629_s6 = scalar_lea.hbm %s869_s24, 128  ;;  %s633_s29 = scalar_lea.hbm %s913_s2, 256 }
 0x146   : > { %p630_p0 = scmp.ne.s32.totalorder %s869_s24, %s629_s6  ;;  %p634_p10 = scmp.lt.s32.totalorder %s869_s24, %s913_s2 }
 0x147   : > { %p635_p11 = scmp.lt.s32.totalorder %s633_s29, %s629_s6 }
 0x148   : > { %p631_p2 = pnand %p630_p0, %p925_p13 }
 0x149   : > { %p636_p4 = por %p635_p11, %p634_p10 }
 0x14a   : > { %p632_p6 = pneg %p631_p2 }
 0x14c   : > { %p637_p3 = pnand %p636_p4, %p632_p6 }
 0x14e   : > { %640 = shalt.err (!%p637_p3)
}
 0x14f   : > { %490 = dma.vmem_to_hbm [thread:$0]  (%p925_p13), %s316_s26, 128, %s869_s24, %s300_s30  }
 0x150 PF: > { %s327_s15 = sand.u32 1, %s679_s9   ;;  %p926_p5 = scmp.ne.s32.totalorder %s920_s22, 0 }
 0x151   : > { %p927_p1 = scmp.ge.s32.totalorder %s699_s14, 2  ;;  %s328_s18 = scalar_lea.sflag [#allocation4], %s327_s15 }
 0x153   : > { %p501_p12 = pnand %p927_p1, %p926_p5 }
 0x155   : > { %p502_p7 = pneg %p501_p12 }
 0x157   : > { %674 = dma.done.wait (%p502_p7), %s328_s18, 128  }
 0x158   : > { %676 = vsyncadd (%p502_p7), %s328_s18, 4294967168  ;;  %s19_s14 = sadd.s32 1, %s699_s14   ;;  %s928_s9 = smov %s683_s10 }
 0x159   : > { %p16_p8 = scmp.ge.s32.totalorder %s19_s14, 4   ;;  %s929_s10 = smov %s687_s11 }
 0x15a   : > { %s930_s11 = smov %s825_s27  ;;  %s931_s12 = smov %s695_s13 }
 0x15b   : > { %s932_s13 = smov %s934_s28  ;;  %18 = sbr.rel (!%p16_p8) target bundleno = 7 (0x7), region = 79 }
 0x160   :  { %333 = vsyncpa [#allocation3], 1 }
 0x161   :  { %335 = vsyncpa [#allocation3 + $0x1], 1 }
 0x162   :  { %336 = vsyncpa [#allocation6], 1 }
 0x163   :  { %338 = vsyncpa [#allocation6 + $0x1], 1 }
 0x164   :  { %339 = vsyncpa [#allocation4], 1 }
 0x165   :  { %341 = vsyncpa [#allocation4 + $0x1], 1 }

</bundles_post_ra>
